<compile_context>
chip_gen: v5e
topology: v5e:2x2
jax: 0.10.0
libtpu: 0.0.40
codegen_flags: <defaults>
</compile_context>

<pallas_src>
import jax
import jax.numpy as jnp
from jax.experimental import pallas as pl
from jax.experimental.pallas import tpu as pltpu


def _round_up(x, m):
    return (x + m - 1) // m * m


def _make_mlp_kernel(num_layers):
    """Fused (Linear -> ReLU) x (num_layers - 1) -> Linear kernel.

    Kernel signature: (x_ref, w0, b0, w1, b1, ..., o_ref).
    Weights are bf16 [in_pad, out_pad]; biases are f32 [1, out_pad];
    activations are carried in f32 and cast to bf16 only for the MXU.
    """

    def kernel(*refs):
        x_ref = refs[0]
        o_ref = refs[-1]
        p = refs[1:-1]

        h = x_ref[...].astype(jnp.float32)
        for i in range(num_layers):
            w = p[2 * i][...]                        # bf16 [in_pad, out_pad]
            b = p[2 * i + 1][...]                    # f32  [1, out_pad]
            h = jnp.dot(h.astype(jnp.bfloat16), w,
                        preferred_element_type=jnp.float32) + b
            if i < num_layers - 1:
                h = jnp.maximum(h, 0.0)              # ReLU on hidden layers
        o_ref[...] = h.astype(o_ref.dtype)           # last layer: no activation

    return kernel


def mlp_forward(x, params, *, block_batch=256):
    """Runs the fused MLP Pallas kernel.

    x:      [batch, n_in] float32
    params: list of (W [in, out], b [1, out]) float32 per Linear layer
            (W is the transpose of torch's Linear.weight, so y = x @ W + b).
    """
    batch, n_in = x.shape
    num_layers = len(params)
    dims = [n_in] + [w.shape[1] for (w, _) in params]
    out_dim = dims[-1]

    # Lane-dense feature dims: pad every feature axis to a multiple of 128.
    pdims = [_round_up(d, 128) for d in dims]

    # Batch tile: multiple of 8 (f32 sublane); grid over the padded batch.
    tb = _round_up(min(block_batch, batch), 8)
    batch_pad = _round_up(batch, tb)
    grid = (batch_pad // tb,)

    # Zero-pad the input; padded rows/lanes are inert and sliced off below.
    x_p = jnp.pad(x.astype(jnp.float32),
                  ((0, batch_pad - batch), (0, pdims[0] - n_in)))

    flat_params = []
    in_specs = [pl.BlockSpec((tb, pdims[0]), lambda i: (i, 0))]
    for li, (w, b) in enumerate(params):
        pin, pout = pdims[li], pdims[li + 1]
        w_p = jnp.pad(w, ((0, pin - w.shape[0]), (0, pout - w.shape[1])))
        w_p = w_p.astype(jnp.bfloat16)               # bf16 MXU operand
        b2 = b.reshape(1, -1).astype(jnp.float32)
        b_p = jnp.pad(b2, ((0, 0), (0, pout - b2.shape[1])))
        flat_params += [w_p, b_p]
        # Constant index_map -> weights/biases stay VMEM-resident across steps.
        in_specs.append(pl.BlockSpec((pin, pout), lambda i: (0, 0)))
        in_specs.append(pl.BlockSpec((1, pout), lambda i: (0, 0)))

    out_spec = pl.BlockSpec((tb, pdims[-1]), lambda i: (i, 0))

    # VMEM budget: double-buffered activation tiles + resident weights/biases.
    resident = 2 * tb * (pdims[0] + pdims[-1]) * 4
    resident += sum(pdims[i] * pdims[i + 1] * 2 + pdims[i + 1] * 4
                    for i in range(num_layers))
    vmem_limit = int(min(max(2 * resident + (2 << 20), 8 << 20), 100 << 20))

    flops = 2 * batch_pad * sum(pdims[i] * pdims[i + 1]
                                for i in range(num_layers))
    bytes_accessed = (batch_pad * (pdims[0] + pdims[-1]) * 4
                      + sum(pdims[i] * pdims[i + 1] * 2 + pdims[i + 1] * 4
                            for i in range(num_layers)))

    out_p = pl.pallas_call(
        _make_mlp_kernel(num_layers),
        out_shape=jax.ShapeDtypeStruct((batch_pad, pdims[-1]), jnp.float32),
        grid=grid,
        in_specs=in_specs,
        out_specs=out_spec,
        compiler_params=pltpu.CompilerParams(
            dimension_semantics=("parallel",),       # megacore-shard on v7x
            vmem_limit_bytes=vmem_limit),
        cost_estimate=pl.CostEstimate(flops=flops, transcendentals=0,
                                      bytes_accessed=bytes_accessed),
    )(x_p, *flat_params)

    return out_p[:batch, :out_dim]


def rqs_params_1d_forward(inputs, params, context=None, **kwargs):
    """Mirrors RQSparams1D.forward: transform(context) if context is given,
    else transform(inputs * 0.0)."""
    if context is not None:
        net_in = context.astype(jnp.float32)
    else:
        net_in = (inputs * 0.0).astype(jnp.float32)
    return mlp_forward(net_in, params, **kwargs)


def init_params(key, n_in, hidden, out_dim, n_hidden):
    """Mirrors nn.Linear default init; W stored as [in, out] (= torch W.T)."""
    dims = [n_in] + [hidden] * n_hidden + [out_dim]
    params = []
    for i in range(len(dims) - 1):
        key, kw, kb = jax.random.split(key, 3)
        bound = 1.0 / float(dims[i]) ** 0.5
        w = jax.random.uniform(kw, (dims[i], dims[i + 1]),
                               minval=-bound, maxval=bound, dtype=jnp.float32)
        b = jax.random.uniform(kb, (1, dims[i + 1]),
                               minval=-bound, maxval=bound, dtype=jnp.float32)
        params.append((w, b))
    return params


def reference_forward(x, params):
    """Pure-JAX f32 reference of the nn.Sequential transform."""
    h = x
    n = len(params)
    for i, (w, b) in enumerate(params):
        h = h @ w + b.reshape(1, -1)
        if i < n - 1:
            h = jnp.maximum(h, 0.0)
    return h


if __name__ == "__main__":
    # Small shapes consistent with the module's forward ([batch, features]).
    features = 8
    multiplier = 3            # out_dim = multiplier * features = 24
    hidden = 32
    n_hidden = 2              # Linear layers: 8 -> 32 -> 32 -> 24
    batch = 64
    out_dim = multiplier * features

    key = jax.random.PRNGKey(0)
    key, kx, kc = jax.random.split(key, 3)
    inputs = jax.random.normal(kx, (batch, features), dtype=jnp.float32)
    params = init_params(key, features, hidden, out_dim, n_hidden)

    # 1) Module-faithful default path (context=None): input is zeroed.
    out = rqs_params_1d_forward(inputs, params, block_batch=32)
    out = jax.block_until_ready(out)
    ref = reference_forward(jnp.zeros_like(inputs), params)
    assert out.shape == (batch, out_dim)
    assert jnp.allclose(out, ref, atol=3e-2, rtol=3e-2), "context=None mismatch"

    # 2) Context path: exercises every weight with non-zero activations.
    #    (Tolerance is loose vs. the f32 reference because the kernel uses
    #     bf16 MXU operands with f32 accumulation.)
    ctx = jax.random.normal(kc, (batch, features), dtype=jnp.float32)
    out_ctx = jax.block_until_ready(
        rqs_params_1d_forward(inputs, params, context=ctx, block_batch=32))
    ref_ctx = reference_forward(ctx, params)
    assert out_ctx.shape == (batch, out_dim)
    assert jnp.allclose(out_ctx, ref_ctx, atol=3e-2, rtol=3e-2), "context mismatch"

    print("KERNEL_OK")
</pallas_src>

<mosaic_0001>
module attributes {stable_mosaic.version = 11 : i64} {
  func.func @kernel(%arg0: i32, %arg1: memref<32x128xf32, #tpu.memory_space<vmem>>, %arg2: memref<128x128xbf16, #tpu.memory_space<vmem>>, %arg3: memref<1x128xf32, #tpu.memory_space<vmem>>, %arg4: memref<128x128xbf16, #tpu.memory_space<vmem>>, %arg5: memref<1x128xf32, #tpu.memory_space<vmem>>, %arg6: memref<128x128xbf16, #tpu.memory_space<vmem>>, %arg7: memref<1x128xf32, #tpu.memory_space<vmem>>, %arg8: memref<32x128xf32, #tpu.memory_space<vmem>>) attributes {dimension_semantics = [#tpu.dimension_semantics<parallel>], iteration_bounds = array<i64: 2>, scalar_prefetch = 0 : i64, scratch_operands = 0 : i64, tpu.core_type = #tpu.core_type<tc>, window_params = [{transform_indices = @transform_0, window_bounds = array<i64: 32, 128>}, {pipeline_mode = #tpu.pipeline_mode<synchronous>, transform_indices = @transform_1, window_bounds = array<i64: 128, 128>}, {pipeline_mode = #tpu.pipeline_mode<synchronous>, transform_indices = @transform_2, window_bounds = array<i64: 1, 128>}, {pipeline_mode = #tpu.pipeline_mode<synchronous>, transform_indices = @transform_3, window_bounds = array<i64: 128, 128>}, {pipeline_mode = #tpu.pipeline_mode<synchronous>, transform_indices = @transform_4, window_bounds = array<i64: 1, 128>}, {pipeline_mode = #tpu.pipeline_mode<synchronous>, transform_indices = @transform_5, window_bounds = array<i64: 128, 128>}, {pipeline_mode = #tpu.pipeline_mode<synchronous>, transform_indices = @transform_6, window_bounds = array<i64: 1, 128>}, {transform_indices = @transform_7, window_bounds = array<i64: 32, 128>}]} {
    %c0 = arith.constant 0 : index
    %c0_0 = arith.constant 0 : index
    %0 = vector.load %arg1[%c0, %c0_0] : memref<32x128xf32, #tpu.memory_space<vmem>>, vector<32x128xf32>
    %c0_1 = arith.constant 0 : index
    %c0_2 = arith.constant 0 : index
    %1 = vector.load %arg2[%c0_1, %c0_2] : memref<128x128xbf16, #tpu.memory_space<vmem>>, vector<128x128xbf16>
    %c0_3 = arith.constant 0 : index
    %c0_4 = arith.constant 0 : index
    %2 = vector.load %arg3[%c0_3, %c0_4] : memref<1x128xf32, #tpu.memory_space<vmem>>, vector<1x128xf32>
    %3 = arith.truncf %0 : vector<32x128xf32> to vector<32x128xbf16>
    %cst = arith.constant dense<0.000000e+00> : vector<32x128xf32>
    %4 = tpu.matmul %3, %1, %cst {dimension_numbers = #tpu.dot_dimension_numbers<[1], [0], [0], [1], [0, 0, 1, 1], [], []>} : vector<32x128xbf16>, vector<128x128xbf16>, vector<32x128xf32> -> vector<32x128xf32>
    %5 = vector.broadcast %2 : vector<1x128xf32> to vector<32x128xf32>
    %6 = arith.addf %4, %5 : vector<32x128xf32>
    %cst_5 = arith.constant 0.000000e+00 : f32
    %7 = vector.broadcast %cst_5 : f32 to vector<32x128xf32>
    %8 = arith.maximumf %6, %7 : vector<32x128xf32>
    %c0_6 = arith.constant 0 : index
    %c0_7 = arith.constant 0 : index
    %9 = vector.load %arg4[%c0_6, %c0_7] : memref<128x128xbf16, #tpu.memory_space<vmem>>, vector<128x128xbf16>
    %c0_8 = arith.constant 0 : index
    %c0_9 = arith.constant 0 : index
    %10 = vector.load %arg5[%c0_8, %c0_9] : memref<1x128xf32, #tpu.memory_space<vmem>>, vector<1x128xf32>
    %11 = arith.truncf %8 : vector<32x128xf32> to vector<32x128xbf16>
    %cst_10 = arith.constant dense<0.000000e+00> : vector<32x128xf32>
    %12 = tpu.matmul %11, %9, %cst_10 {dimension_numbers = #tpu.dot_dimension_numbers<[1], [0], [0], [1], [0, 0, 1, 1], [], []>} : vector<32x128xbf16>, vector<128x128xbf16>, vector<32x128xf32> -> vector<32x128xf32>
    %13 = vector.broadcast %10 : vector<1x128xf32> to vector<32x128xf32>
    %14 = arith.addf %12, %13 : vector<32x128xf32>
    %cst_11 = arith.constant 0.000000e+00 : f32
    %15 = vector.broadcast %cst_11 : f32 to vector<32x128xf32>
    %16 = arith.maximumf %14, %15 : vector<32x128xf32>
    %c0_12 = arith.constant 0 : index
    %c0_13 = arith.constant 0 : index
    %17 = vector.load %arg6[%c0_12, %c0_13] : memref<128x128xbf16, #tpu.memory_space<vmem>>, vector<128x128xbf16>
    %c0_14 = arith.constant 0 : index
    %c0_15 = arith.constant 0 : index
    %18 = vector.load %arg7[%c0_14, %c0_15] : memref<1x128xf32, #tpu.memory_space<vmem>>, vector<1x128xf32>
    %19 = arith.truncf %16 : vector<32x128xf32> to vector<32x128xbf16>
    %cst_16 = arith.constant dense<0.000000e+00> : vector<32x128xf32>
    %20 = tpu.matmul %19, %17, %cst_16 {dimension_numbers = #tpu.dot_dimension_numbers<[1], [0], [0], [1], [0, 0, 1, 1], [], []>} : vector<32x128xbf16>, vector<128x128xbf16>, vector<32x128xf32> -> vector<32x128xf32>
    %21 = vector.broadcast %18 : vector<1x128xf32> to vector<32x128xf32>
    %22 = arith.addf %20, %21 : vector<32x128xf32>
    %c0_17 = arith.constant 0 : index
    %c0_18 = arith.constant 0 : index
    %23 = vector.load %arg8[%c0_17, %c0_18] : memref<32x128xf32, #tpu.memory_space<vmem>>, vector<32x128xf32>
    tpu.vector_store %arg8[%c0_17, %c0_18], %22 {strides = array<i32>} : memref<32x128xf32, #tpu.memory_space<vmem>>, vector<32x128xf32>,
    return
  }
  func.func @transform_0(%arg0: i32) -> (i32, i32) {
    %c0_i32 = arith.constant 0 : i32
    %c0_i32_0 = arith.constant 0 : i32
    return %arg0, %c0_i32 : i32, i32
  }
  func.func @transform_1(%arg0: i32) -> (i32, i32) {
    %c0_i32 = arith.constant 0 : i32
    %c0_i32_0 = arith.constant 0 : i32
    %c0_i32_1 = arith.constant 0 : i32
    return %c0_i32, %c0_i32_0 : i32, i32
  }
  func.func @transform_2(%arg0: i32) -> (i32, i32) {
    %c0_i32 = arith.constant 0 : i32
    %c0_i32_0 = arith.constant 0 : i32
    %c0_i32_1 = arith.constant 0 : i32
    return %c0_i32, %c0_i32_0 : i32, i32
  }
  func.func @transform_3(%arg0: i32) -> (i32, i32) {
    %c0_i32 = arith.constant 0 : i32
    %c0_i32_0 = arith.constant 0 : i32
    %c0_i32_1 = arith.constant 0 : i32
    return %c0_i32, %c0_i32_0 : i32, i32
  }
  func.func @transform_4(%arg0: i32) -> (i32, i32) {
    %c0_i32 = arith.constant 0 : i32
    %c0_i32_0 = arith.constant 0 : i32
    %c0_i32_1 = arith.constant 0 : i32
    return %c0_i32, %c0_i32_0 : i32, i32
  }
  func.func @transform_5(%arg0: i32) -> (i32, i32) {
    %c0_i32 = arith.constant 0 : i32
    %c0_i32_0 = arith.constant 0 : i32
    %c0_i32_1 = arith.constant 0 : i32
    return %c0_i32, %c0_i32_0 : i32, i32
  }
  func.func @transform_6(%arg0: i32) -> (i32, i32) {
    %c0_i32 = arith.constant 0 : i32
    %c0_i32_0 = arith.constant 0 : i32
    %c0_i32_1 = arith.constant 0 : i32
    return %c0_i32, %c0_i32_0 : i32, i32
  }
  func.func @transform_7(%arg0: i32) -> (i32, i32) {
    %c0_i32 = arith.constant 0 : i32
    %c0_i32_0 = arith.constant 0 : i32
    return %arg0, %c0_i32 : i32, i32
  }
}

</mosaic_0001>

<bundles_post_ra>
// kernel: tpu_custom_call.1
= control target key start
LH: loop header
LB: loop body
LE: loop exit
PB: predicated region body
PF: predicated region fallthrough
CT: control target
= control target key end

     0   :  { %s1412_s0 = inlined_call_operand.hbm [shape: f32[64,128], index: 0, kind: input, shape index: {}]   ;;  %s1413_s1 = inlined_call_operand.hbm [shape: bf16[128,128], index: 1, kind: input, shape index: {}]   ;;  %s1414_s2 = inlined_call_operand.vmem [shape: f32[1,128], index: 2, kind: input, shape index: {}]   ;;  %s1415_s3 = inlined_call_operand.hbm [shape: bf16[128,128], index: 3, kind: input, shape index: {}]   ;;  %s1416_s4 = inlined_call_operand.vmem [shape: f32[1,128], index: 4, kind: input, shape index: {}]   ;;  %s1417_s5 = inlined_call_operand.hbm [shape: bf16[128,128], index: 5, kind: input, shape index: {}]   ;;  %s1418_s6 = inlined_call_operand.vmem [shape: f32[1,128], index: 6, kind: input, shape index: {}]   ;;  %s1419_s7 = inlined_call_operand.hbm [shape: f32[64,128], index: 7, kind: output, shape index: {}]  }
   0x1   :  { %1420 = sst [smem:[#allocation15_spill]] %s1413_s1 }
   0x2   :  { %12 = vsyncpa [#allocation3], 0 }
   0x3   :  { %14 = vsyncpa [#allocation3 + $0x1], 0 }
   0x4   :  { %15 = vsyncpa [#allocation6], 0 }
   0x5   :  { %16 = vsyncpa [#allocation9], 0 }
   0x6   :  { %17 = vsyncpa [#allocation4], 0 }
   0x7   :  { %19 = vsyncpa [#allocation4 + $0x1], 0  ;;  %s1233_s24 = smov 0   ;;  %s1235_s25 = smov 0  }
   0x8   :  { %s1237_s26 = smov 0   ;;  %s1239_s27 = smov 0  }
   0x9 LB: > { %s1254_s28 = sadd.s32 4294967295, %s1182_s27   ;;  %s752_s29 = sadd.s32 4294967294, %s1182_s27   ;;  %s1182_s27 = sphi %s1239_s27, %s1432_s27   ;;  %s1178_s26 = sphi %s1237_s26, %s1431_s26   ;;  %s1174_s25 = sphi %s1235_s25, %s1430_s25   ;;  %s1170_s24 = sphi %s1233_s24, %s1429_s24  }
   0xa   : > { %p45_p0 = scmp.ne.s32.totalorder %s1174_s25, %s1170_s24  ;;  %p46_p1 = scmp.eq.s32.totalorder %s1254_s28, 0 }
   0xb   : > { %p195_p2 = scmp.eq.s32.totalorder %s1254_s28, 1  ;;  %p201_p3 = scmp.eq.s32.totalorder %s752_s29, 1 }
   0xc   : > { %p1263_p4 = por %p46_p1, %p45_p0  ;;  %p753_p5 = scmp.ge.s32.totalorder %s1182_s27, 1 }
   0xd   : > { %p1268_p6 = por %p201_p3, %p45_p0  ;;  %p208_p7 = scmp.lt.s32.totalorder %s1182_s27, 3 }
   0xe   : > { %s1423_s1 = sld [smem:[#allocation15_spill]]  ;;  %s1184_s13 = smov [#allocation5]  }
   0xf   : > { %p1276_p8 = pnand %p753_p5, %p208_p7  ;;  %s221_s14 = sshll.u32 %s1184_s13, 4  ;;  %s222_s14 = int_to_ptr.vmem [resolvable:$true] %s221_s14 }
  0x10   : > { %s236_s18 = sshll.u32 %s1415_s3, 4  ;;  %s1185_s19 = smov 64   ;;  %s237_s18 = int_to_ptr.hbm [resolvable:$true] %s236_s18 }
  0x11   : > { %p918_p9 = pneg %p1276_p8  ;;  %s1186_s20 = smov 4  }
  0x12   : > { %s1187_s21 = smov [#allocation7]   ;;  %s253_s9 = sshll.u32 %s1417_s5, 4  ;;  %s254_s9 = int_to_ptr.hbm [resolvable:$true] %s253_s9 }
  0x13   : > { %p1284_p10 = pnand %p918_p9, %p46_p1  ;;  %s238_s22 = sshll.u32 %s1187_s21, 4  ;;  %s239_s22 = int_to_ptr.vmem [resolvable:$true] %s238_s22 }
  0x14   : > { %s219_s11 = sshll.u32 %s1423_s1, 4  ;;  %s1188_s10 = smov [#allocation8]   ;;  %s220_s11 = int_to_ptr.hbm [resolvable:$true] %s219_s11 }
  0x15   : > { %921 = dma.hbm_to_vmem [thread:$0]  (!%p1284_p10), %s220_s11, 1024, %s222_s14, [#allocation6], %s1185_s19, %s1185_s19, %s1186_s20  }
  0x16   : > { %924 = dma.hbm_to_vmem [thread:$0]  (!%p1284_p10), %s237_s18, 1024, %s239_s22, [#allocation6], %s1185_s19, %s1185_s19, %s1186_s20  }
  0x17   : > { %s255_s13 = sshll.u32 %s1188_s10, 4  ;;  %s1300_s11 = sadd.s32 1, %s1182_s27   ;;  %s256_s13 = int_to_ptr.vmem [resolvable:$true] %s255_s13 }
  0x18   : > { %927 = dma.hbm_to_vmem [thread:$0]  (!%p1284_p10), %s254_s9, 1024, %s256_s13, [#allocation9], %s1185_s19, %s1185_s19, %s1186_s20  }
  0x19   : > { %s29_s14 = ssub.s32 %s1182_s27, %s1300_s11  ;;  %s32_s16 = sadd.s32 1, %s1178_s26 }
  0x1a   : > { %p30_p12 = scmp.eq.s32.totalorder %s29_s14, 0  ;;  %p39_p13 = scmp.ne.s32.totalorder %s1178_s26, %s1174_s25 }
  0x1b   : > { %p40_p0 = scmp.eq.s32.totalorder %s1182_s27, 0  ;;  %p939_p3 = scmp.lt.s32.totalorder %s1182_s27, 2 }
  0x1c   : > { %s1312_s17 = scalar_select %p30_p12, %s1178_s26, %s32_s16  }
  0x1d   : > { %p41_p5 = por %p40_p0, %p39_p13  ;;  %p1316_p7 = por %p195_p2, %p39_p13 }
  0x1e   : > { %s272_s21 = sand.u32 1, %s1178_s26   ;;  %s868_s22 = sshll.u32 %s1182_s27, 5 }
  0x1f   : > { %s758_s15 = sshll.u32 %s272_s21, 5  ;;  %s281_s20 = scalar_lea.hbm %s1412_s0, %s868_s22 }
  0x20   : > { %s282_s29 = sshll.u32 %s281_s20, 4  ;;  %s276_s9 = scalar_lea.vmem [#allocation2], %s758_s15  ;;  %s283_s29 = int_to_ptr.hbm [resolvable:$true] %s282_s29 }
  0x21   : > { %s284_s10 = sshll.u32 %s276_s9, 4  ;;  %p1327_p9 = pnand %p939_p3, %p41_p5  ;;  %s285_s10 = int_to_ptr.vmem [resolvable:$true] %s284_s10 }
  0x22   : > { %s273_s14 = scalar_lea.sflag [#allocation3], %s272_s21  ;;  %s1078_s16 = sshra.s32 %s283_s29, 4  ;;  %s1079_s16 = int_to_ptr.hbm [resolvable:$true] %s1078_s16 }
  0x23   : > { %s1080_s1 = scalar_lea.hbm %s1079_s16, 32  ;;  %p1082_p10 = pneg %p1327_p9 }
  0x24   : > { %p1081_p2 = scmp.ne.s32.totalorder %s1079_s16, %s1080_s1  ;;  %s1085_s23 = scalar_lea.hbm %s1412_s0, 64 }
  0x25   : > { %p1086_p0 = scmp.lt.s32.totalorder %s1079_s16, %s1412_s0  ;;  %p1087_p3 = scmp.lt.s32.totalorder %s1085_s23, %s1080_s1 }
  0x26   : > { %p1083_p12 = pnand %p1082_p10, %p1081_p2 }
  0x27   : > { %p1088_p5 = por %p1087_p3, %p1086_p0 }
  0x28   : > { %p1084_p13 = pneg %p1083_p12 }
  0x2a   : > { %p1089_p11 = pnand %p1088_p5, %p1084_p13 }
  0x2c   : > { %1092 = shalt.err (!%p1089_p11)
}
  0x2d   : > { %s1189_s21 = smov 128   ;;  %s1190_s9 = smov 8  }
  0x2e   : > { %931 = dma.hbm_to_vmem [thread:$0]  (!%p1327_p9), %s283_s29, 512, %s285_s10, %s273_s14, %s1189_s21, %s1189_s21, %s1190_s9  }
  0x2f   : > { %296 = sbr.rel (%p1276_p8) target bundleno = 531 (0x213), region = 48  ;;  %s1344_s22 = sand.u32 (!%p1276_p8), 1, %s1174_s25  }
  0x30   : > { %s762_s16 = sshll.u32 (!%p1276_p8), %s1344_s22, 5  ;;  %s299_s1 = scalar_lea.sflag (!%p1276_p8), [#allocation3], %s1344_s22 }
  0x31   : > { %s1350_s15 = scalar_lea.vmem (!%p1276_p8), [#allocation2], %s762_s16 }
  0x34   : > { %1153 = dma.done.wait (%p1263_p4), %s299_s1, 512  }
  0x35   : > { %1155 = vsyncadd (%p1263_p4), %s299_s1, 4294966784 }
  0x36   : > { %1157 = dma.done.wait (%p46_p1), [#allocation6], 2048  }
  0x37   : > { %1159 = vsyncadd (%p46_p1), [#allocation6], 4294965248 }
  0x38   : > { %1161 = dma.done.wait (%p46_p1), [#allocation9], 1024  }
  0x39   : > { %1163 = vsyncadd (%p46_p1), [#allocation9], 4294966272  ;;  %v876_v0 = vld [vmem:[#allocation5 + $0x38] sm:$0xff]  ;;  %v875_v1 = vld [vmem:[#allocation5 + $0x30] sm:$0xff]  ;;  %s348_s23 = scalar_lea.vmem [#allocation10], %s762_s16  ;;  %s893_s19 = sshll.u32 %s1254_s28, 5 }
  0x3a   : > { %425 = vmatpush.bf16.msra.mxu0 %v876_v0  ;;  %894 = vmatpush.bf16.msra.mxu3 %v876_v0  ;;  %v884_v2 = vld [vmem:[#allocation7 + $0x38] sm:$0xff]  ;;  %v874_v3 = vld [vmem:[#allocation5 + $0x28] sm:$0xff]  ;;  %v883_v4 = vld [vmem:[#allocation7 + $0x30] sm:$0xff]  ;;  %s646_s9 = scalar_lea.hbm %s1419_s7, %s893_s19  ;;  %s647_s1 = sshll.u32 %s348_s23, 4  ;;  %s648_s1 = int_to_ptr.vmem [resolvable:$true] %s647_s1 }
  0x3b   : > { %518 = vmatpush.bf16.msra.mxu1 %v884_v2  ;;  %v873_v5 = vld [vmem:[#allocation5 + $0x20] sm:$0xff]  ;;  %v882_v6 = vld [vmem:[#allocation7 + $0x28] sm:$0xff]  ;;  %v872_v7 = vld [vmem:[#allocation5 + $0x18] sm:$0xff]  ;;  %s635_s16 = scalar_lea.sflag [#allocation4], %s1344_s22  ;;  %s1128_s10 = scalar_lea.hbm %s1419_s7, 64 }
  0x3c   : > { %v881_v8 = vld [vmem:[#allocation7 + $0x20] sm:$0xff]  ;;  %v871_v9 = vld [vmem:[#allocation5 + $0x10] sm:$0xff]  ;;  %v870_v10 = vld [vmem:[#allocation5 + $0x8] sm:$0xff] }
  0x3d   : > { %v869_v11 = vld [vmem:[#allocation5] sm:$0xff]  ;;  %v352_v13 = vld [vmem:[%s1350_s15 + $0x8] sm:$0xff]  ;;  %v353_v14 = vld [vmem:[%s1350_s15 + $0x10] sm:$0xff] }
  0x3e   : > { %426 = vmatpush.bf16.msra.mxu0 %v875_v1  ;;  %895 = vmatpush.bf16.msra.mxu3 %v875_v1  ;;  %v351_v12 = vld [vmem:[%s1350_s15] sm:$0xff]  ;;  %v354_v15 = vld [vmem:[%s1350_s15 + $0x18] sm:$0xff]  ;;  %v879_v19 = vld [vmem:[#allocation7 + $0x10] sm:$0xff]  ;;  %s649_s15 = sshll.u32 %s646_s9, 4  ;;  %s650_s15 = int_to_ptr.hbm [resolvable:$true] %s649_s15 }
  0x3f   : > { %519 = vmatpush.bf16.msra.mxu1 %v883_v4  ;;  %v372_v16 = vpack.c.bf16 %v352_v13, %v351_v12  ;;  %v373_v17 = vpack.c.bf16 %v354_v15, %v353_v14  ;;  %v880_v18 = vld [vmem:[#allocation7 + $0x18] sm:$0xff]  ;;  %v878_v20 = vld [vmem:[#allocation7 + $0x8] sm:$0xff]  ;;  %v877_v21 = vld [vmem:[#allocation7] sm:$0xff]  ;;  %s1122_s30 = sshra.s32 %s650_s15, 4  ;;  %s1123_s30 = int_to_ptr.hbm [resolvable:$true] %s1122_s30 }
  0x40   : > { %v892_v22 = vld [vmem:[#allocation8 + $0x38] sm:$0xff]  ;;  %v891_v24 = vld [vmem:[#allocation8 + $0x30] sm:$0xff]  ;;  %v985_v25 = vld [vmem:[%s1414_s2] ss:$0 sm:$0xff]  ;;  %s1124_s12 = scalar_lea.hbm %s1123_s30, 32  ;;  %p1129_p11 = scmp.lt.s32.totalorder %s1123_s30, %s1419_s7 }
  0x41   : > { %611 = vmatpush.bf16.msra.mxu2 %v892_v22  ;;  %v890_v26 = vld [vmem:[#allocation8 + $0x28] sm:$0xff]  ;;  %v889_v31 = vld [vmem:[#allocation8 + $0x20] sm:$0xff]  ;;  %v888_v41 = vld [vmem:[#allocation8 + $0x18] sm:$0xff]  ;;  %p1125_p1 = scmp.ne.s32.totalorder %s1123_s30, %s1124_s12  ;;  %p1130_p9 = scmp.lt.s32.totalorder %s1128_s10, %s1124_s12 }
  0x42   : > { %427 = vmatpush.bf16.msra.mxu0 %v874_v3  ;;  %896 = vmatpush.bf16.msra.mxu3 %v874_v3  ;;  %v887_v42 = vld [vmem:[#allocation8 + $0x10] sm:$0xff]  ;;  %v886_v43 = vld [vmem:[#allocation8 + $0x8] sm:$0xff]  ;;  %v885_v44 = vld [vmem:[#allocation8] sm:$0xff] }
  0x43   : > { %520 = vmatpush.bf16.msra.mxu1 %v882_v6  ;;  %v986_v46 = vld [vmem:[%s1416_s4] ss:$0 sm:$0xff]  ;;  %p1126_p4 = pnand %p1125_p1, %p1316_p7  ;;  %p1131_p2 = por %p1130_p9, %p1129_p11 }
  0x44   : > { %v987_v60 = vld [vmem:[%s1418_s6] ss:$0 sm:$0xff] }
  0x45   : > { %612 = vmatpush.bf16.msra.mxu2 %v891_v24  ;;  %p1127_p8 = pneg %p1126_p4 }
  0x46   : > { %428 = vmatpush.bf16.msra.mxu0 %v873_v5  ;;  %897 = vmatpush.bf16.msra.mxu3 %v873_v5 }
  0x47   : > { %521 = vmatpush.bf16.msra.mxu1 %v881_v8  ;;  %p1132_p10 = pnand %p1131_p2, %p1127_p8 }
  0x49   : > { %613 = vmatpush.bf16.msra.mxu2 %v890_v26 }
  0x4a   : > { %429 = vmatpush.bf16.msra.mxu0 %v872_v7  ;;  %898 = vmatpush.bf16.msra.mxu3 %v872_v7 }
  0x4b   : > { %522 = vmatpush.bf16.msra.mxu1 %v880_v18 }
  0x4d   : > { %614 = vmatpush.bf16.msra.mxu2 %v889_v31 }
  0x4e   : > { %430 = vmatpush.bf16.msra.mxu0 %v871_v9  ;;  %899 = vmatpush.bf16.msra.mxu3 %v871_v9 }
  0x4f   : > { %523 = vmatpush.bf16.msra.mxu1 %v879_v19 }
  0x51   : > { %615 = vmatpush.bf16.msra.mxu2 %v888_v41 }
  0x52   : > { %431 = vmatpush.bf16.msra.mxu0 %v870_v10  ;;  %900 = vmatpush.bf16.msra.mxu3 %v870_v10 }
  0x53   : > { %524 = vmatpush.bf16.msra.mxu1 %v878_v20 }
  0x55   : > { %616 = vmatpush.bf16.msra.mxu2 %v887_v42 }
  0x56   : > { %432 = vmatpush.bf16.msra.mxu0 %v869_v11  ;;  %901 = vmatpush.bf16.msra.mxu3 %v869_v11 }
  0x57   : > { %525 = vmatpush.bf16.msra.mxu1 %v877_v21 }
  0x59   : > { %433 = vmatmul.bf16.vlgmr.msra.gmra.mxu0 %v372_v16  ;;  %438 = vmatmul.bf16.vlgmr.msra.gmra.mxu3 %v373_v17 }
  0x5a   : > { %617 = vmatpush.bf16.msra.mxu2 %v886_v43 }
  0x5e   : > { %618 = vmatpush.bf16.msra.mxu2 %v885_v44 }
  0xd6   : > { %v434_v23 = vpop.f32.mrf.mxu0 }
  0xd7   : > { %v435_v27 = vadd.f32 %v985_v25, %v434_v23 }
  0xd9   : > { %v444_v32 = vmax.f32 %v435_v27, 0.0 }
  0xdc   : > { %v439_v29 = vpop.f32.mrf.mxu3 }
  0xdd   : > { %v440_v36 = vadd.f32 %v985_v25, %v439_v29 }
  0xde   : > { %v436_v28 = vpop.f32.mrf.mxu0 }
  0xdf   : > { %v437_v30 = vadd.f32 %v985_v25, %v436_v28  ;;  %v446_v38 = vmax.f32 %v440_v36, 0.0 }
  0xe1   : > { %v445_v33 = vmax.f32 %v437_v30, 0.0 }
  0xe3   : > { %v465_v34 = vpack.c.bf16 %v445_v33, %v444_v32 }
  0xe4   : > { %v441_v35 = vpop.f32.mrf.mxu3 }
  0xe5   : > { %526 = vmatmul.bf16.vlgmr.msra.gmra.mxu1 %v465_v34  ;;  %v442_v37 = vadd.f32 %v985_v25, %v441_v35 }
  0xe7   : > { %v447_v39 = vmax.f32 %v442_v37, 0.0 }
  0xe9   : > { %v466_v40 = vpack.c.bf16 %v447_v39, %v446_v38 }
  0xf5   : > { %531 = vmatmul.bf16.gmra.mxu1 %v466_v40 }
 0x162   : > { %v527_v45 = vpop.f32.mrf.mxu1 }
 0x163   : > { %v528_v47 = vadd.f32 %v986_v46, %v527_v45 }
 0x165   : > { %v537_v50 = vmax.f32 %v528_v47, 0.0 }
 0x16a   : > { %v529_v48 = vpop.f32.mrf.mxu1 }
 0x16b   : > { %v530_v49 = vadd.f32 %v986_v46, %v529_v48 }
 0x16d   : > { %v538_v51 = vmax.f32 %v530_v49, 0.0 }
 0x16f   : > { %v558_v52 = vpack.c.bf16 %v538_v51, %v537_v50 }
 0x171   : > { %619 = vmatmul.bf16.vlgmr.msra.gmra.mxu2 %v558_v52 }
 0x172   : > { %v532_v53 = vpop.f32.mrf.mxu1 }
 0x173   : > { %v533_v54 = vadd.f32 %v986_v46, %v532_v53 }
 0x175   : > { %v539_v57 = vmax.f32 %v533_v54, 0.0 }
 0x17a   : > { %v534_v55 = vpop.f32.mrf.mxu1 }
 0x17b   : > { %v535_v56 = vadd.f32 %v986_v46, %v534_v55 }
 0x17d   : > { %v540_v58 = vmax.f32 %v535_v56, 0.0 }
 0x17f   : > { %v559_v59 = vpack.c.bf16 %v540_v58, %v539_v57 }
 0x181   : > { %624 = vmatmul.bf16.gmra.mxu2 %v559_v59 }
 0x1f4   : > { %v620_v61 = vpop.f32.mrf.mxu2 }
 0x1f5   : > { %v621_v62 = vadd.f32 %v987_v60, %v620_v61 }
 0x1f7   : > { %630 = vst [vmem:[%s348_s23] sm:$0xff] %v621_v62 }
 0x1fc   : > { %v622_v63 = vpop.f32.mrf.mxu2 }
 0x1fd   : > { %v623_v0 = vadd.f32 %v987_v60, %v622_v63 }
 0x1ff   : > { %631 = vst [vmem:[%s348_s23 + $0x8] sm:$0xff] %v623_v0 }
 0x204   : > { %v625_v1 = vpop.f32.mrf.mxu2 }
 0x205   : > { %v626_v2 = vadd.f32 %v987_v60, %v625_v1 }
 0x207   : > { %632 = vst [vmem:[%s348_s23 + $0x10] sm:$0xff] %v626_v2 }
 0x20c   : > { %v627_v3 = vpop.f32.mrf.mxu2 }
 0x20d   : > { %v628_v4 = vadd.f32 %v987_v60, %v627_v3 }
 0x20f   : > { %633 = vst [vmem:[%s348_s23 + $0x18] sm:$0xff] %v628_v4 }
 0x210   : > { %1135 = shalt.err (!%p1132_p10)
}
 0x211   : > { %s1191_s22 = smov 128   ;;  %s1192_s23 = smov 8  }
 0x212   : > { %916 = dma.vmem_to_hbm [thread:$0]  (%p1316_p7), %s648_s1, 512, %s650_s15, %s635_s16, %s1191_s22, %s1191_s22, %s1192_s23  }
 0x213 PF: > { %s664_s19 = sand.u32 1, %s1170_s24   ;;  %p1428_p12 = scmp.ge.s32.totalorder %s1182_s27, 2 }
 0x214   : > { %s665_s20 = scalar_lea.sflag [#allocation4], %s664_s19 }
 0x215   : > { %p933_p13 = pnand %p1428_p12, %p1268_p6 }
 0x217   : > { %p934_p0 = pneg %p933_p13 }
 0x219   : > { %1165 = dma.done.wait (%p934_p0), %s665_s20, 512  }
 0x21a   : > { %1167 = vsyncadd (%p934_p0), %s665_s20, 4294966784  ;;  %p22_p3 = scmp.ge.s32.totalorder %s1300_s11, 4   ;;  %s1429_s24 = smov %s1174_s25 }
 0x21b   : > { %s1430_s25 = smov %s1178_s26  ;;  %s1431_s26 = smov %s1312_s17 }
 0x21c   : > { %s1432_s27 = smov %s1300_s11  ;;  %24 = sbr.rel (!%p22_p3) target bundleno = 9 (0x9), region = 105 }
 0x221   :  { %671 = vsyncpa [#allocation3], 1 }
 0x222   :  { %673 = vsyncpa [#allocation3 + $0x1], 1 }
 0x223   :  { %674 = vsyncpa [#allocation6], 1 }
 0x224   :  { %675 = vsyncpa [#allocation9], 1 }
 0x225   :  { %676 = vsyncpa [#allocation4], 1 }
 0x226   :  { %678 = vsyncpa [#allocation4 + $0x1], 1 }

</bundles_post_ra>
